<compile_context>
chip_gen: v7x
topology: tpu7x:2x2x1
jax: 0.10.0
libtpu: 0.0.40
codegen_flags: <defaults>
</compile_context>

<pallas_src>
import jax
import jax.numpy as jnp
from jax.experimental import pallas as pl
from jax.experimental.pallas import tpu as pltpu


def _round_up(x, m):
    return (x + m - 1) // m * m


def _cdiv(a, b):
    return -(-a // b)


def _pad2(a, rows, cols):
    """Zero-pad a 2-D array up to (rows, cols); no-op if already that shape."""
    pr, pc = rows - a.shape[0], cols - a.shape[1]
    if pr == 0 and pc == 0:
        return a
    return jnp.pad(a, ((0, pr), (0, pc)))


def _vmem_capacity_bytes():
    """Physical per-core VMEM (128 MiB v5e/v6e, 64 MiB v7x); safe fallback."""
    try:
        cap = getattr(pltpu.get_tpu_info(), "vmem_capacity_bytes", None)
        if cap:
            return int(cap)
    except Exception:
        pass
    return 64 * 1024 * 1024  # conservative (v7x per-TC) fallback


def two_layer_nn_kernel(x_ref, w1_ref, b1_ref, w2_ref, b2_ref, o_ref):
    x = x_ref[...]
    # Layer 1 on the MXU with f32 accumulation; bias + relu on the VPU.
    h = jnp.dot(x, w1_ref[...], preferred_element_type=jnp.float32)
    h = jnp.maximum(h + b1_ref[...], 0.0)
    # Feed the storage dtype (bf16 for bf16 inputs) back into the 2nd matmul so
    # the MXU runs at full rate; keep f32 accumulation. No-op for f32.
    h = h.astype(x_ref.dtype)
    y = jnp.dot(h, w2_ref[...], preferred_element_type=jnp.float32) + b2_ref[...]
    # Residual add in f32, single cast at the final store.
    o_ref[...] = (y + x.astype(jnp.float32)).astype(o_ref.dtype)


def make_two_layer_nn(w1, b1, w2, b2, *, tile_b=512):
    """Build the forward fn. Weights are stored transposed (in, out), so
    x @ W here == PyTorch x @ W^T.

      w1: (D_in, H), b1: (1, H), w2: (H, D_out), b2: (1, D_out)

    Padding of the parameters is done ONCE here (hoisted out of the per-call
    path); the returned fwd(x) only pads/slices the batch.
    """
    d_in, hidden = w1.shape
    d_out = w2.shape[1]
    assert d_in == d_out, "residual=True requires input_dim == output_dim"

    # Lane-dense (128-aligned) feature dims.
    d_pad = _round_up(d_in, 128)
    h_pad = _round_up(hidden, 128)
    o_pad = _round_up(d_out, 128)

    # Pad weights once (zero pad => padded outputs are exactly zero, stripped
    # in fwd). Skipped entirely when dims are already aligned.
    w1_p = _pad2(w1, d_pad, h_pad)
    b1_p = _pad2(b1, 1, h_pad)
    w2_p = _pad2(w2, h_pad, o_pad)
    b2_p = _pad2(b2, 1, o_pad)

    w_bytes = jnp.dtype(w1.dtype).itemsize
    vmem_cap = _vmem_capacity_bytes()
    vmem_budget = int(vmem_cap * 0.75)

    def fwd(x):
        B, d = x.shape
        assert d == d_in, f"expected input dim {d_in}, got {d}"
        dtype = x.dtype
        x_bytes = jnp.dtype(dtype).itemsize

        def vmem_estimate(tb):
            # Double-buffered (pipelined) x / out tiles.
            tiles = 2 * (tb * d_pad + tb * o_pad) * x_bytes
            # Weight/bias blocks are VMEM-resident but still double-buffered by
            # the default pipeliner — budget 2x.
            weights = 2 * (d_pad * h_pad + h_pad * o_pad + h_pad + o_pad) * w_bytes
            # In-kernel intermediates: f32 h, storage-dtype copy of h, f32 y,
            # f32 copy of x for the residual add.
            interm = tb * h_pad * (4 + x_bytes) + tb * (o_pad + d_pad) * 4
            return tiles + weights + interm

        b_ceil = _round_up(B, 8)  # f32/bf16 sublane-aligned upper bound
        tb = max(8, min(_round_up(tile_b, 8), b_ceil))

        if vmem_estimate(8) > vmem_budget:
            # TODO(synk): add an H-tiled fallback (grid axis over hidden dim,
            # "arbitrary" semantics + f32 accumulator scratch) for weight sets
            # that don't fit resident in VMEM (relevant on v7x's 64 MiB).
            raise ValueError(
                "Two_Layer_NN weights too large for resident-weight Pallas "
                f"kernel on this chip (need ~{vmem_estimate(8)} B, budget "
                f"{vmem_budget} B)."
            )

        # Shrink until it fits ...
        while tb > 8 and vmem_estimate(tb) > vmem_budget:
            tb = max(8, _round_up(tb // 2, 8))
        # ... then grow to fill the budget (bigger tiles amortize the ~0.35 µs
        # per-grid-step overhead in this memory-bound regime).
        while tb < b_ceil:
            nxt = min(_round_up(tb * 2, 8), b_ceil)
            if nxt == tb or vmem_estimate(nxt) > vmem_budget:
                break
            tb = nxt

        # Rebalance: cap batch-padding waste at <8 rows per tile instead of up
        # to a whole tile (e.g. B=513, tb=512 would otherwise pad to 1024).
        num_tiles = _cdiv(B, tb)
        tb = _round_up(_cdiv(B, num_tiles), 8)
        b_pad = num_tiles * tb

        x_p = _pad2(x, b_pad, d_pad)

        params = {"dimension_semantics": ("parallel",)}  # v7x: shard over TCs
        est = vmem_estimate(tb)
        if est > 16 * 1024 * 1024:
            # Raise the scoped-VMEM cap only when needed, and never above the
            # physical per-core capacity (64 MiB on v7x).
            params["vmem_limit_bytes"] = int(min(est * 1.25, vmem_cap * 0.9))
        compiler_params = pltpu.CompilerParams(**params)

        vmem = pltpu.MemorySpace.VMEM
        out = pl.pallas_call(
            two_layer_nn_kernel,
            out_shape=jax.ShapeDtypeStruct((b_pad, o_pad), dtype),
            grid=(num_tiles,),
            in_specs=[
                # x: new tile per grid step (pipelined DMA against MXU compute).
                pl.BlockSpec((tb, d_pad), lambda i: (i, 0), memory_space=vmem),
                # Weights / biases: constant block index -> stay VMEM-resident.
                pl.BlockSpec((d_pad, h_pad), lambda i: (0, 0), memory_space=vmem),
                pl.BlockSpec((1, h_pad), lambda i: (0, 0), memory_space=vmem),
                pl.BlockSpec((h_pad, o_pad), lambda i: (0, 0), memory_space=vmem),
                pl.BlockSpec((1, o_pad), lambda i: (0, 0), memory_space=vmem),
            ],
            out_specs=pl.BlockSpec((tb, o_pad), lambda i: (i, 0), memory_space=vmem),
            compiler_params=compiler_params,
        )(x_p, w1_p, b1_p, w2_p, b2_p)

        return out[:B, :d_out]

    return fwd


def _torch_linear_init(key, fan_in, fan_out):
    """Deterministic stand-in for nn.Linear's default U(-1/sqrt(fan_in), .) init.

    Returns weight in (in, out) layout and bias as (1, out).
    """
    kw, kb = jax.random.split(key)
    bound = 1.0 / jnp.sqrt(fan_in)
    w = jax.random.uniform(kw, (fan_in, fan_out), jnp.float32, -bound, bound)
    b = jax.random.uniform(kb, (1, fan_out), jnp.float32, -bound, bound)
    return w, b


if __name__ == "__main__":
    # Small shapes consistent with the module: input_dim == output_dim (residual).
    batch, input_dim, hidden_dim = 8, 16, 32
    output_dim = input_dim

    key = jax.random.PRNGKey(0)
    kx, k1, k2 = jax.random.split(key, 3)

    x = jax.random.normal(kx, (batch, input_dim), jnp.float32)
    w1, b1 = _torch_linear_init(k1, input_dim, hidden_dim)
    w2, b2 = _torch_linear_init(k2, hidden_dim, output_dim)

    fwd = make_two_layer_nn(w1, b1, w2, b2)
    out = fwd(x)
    out = jax.block_until_ready(out)

    # Pure-JAX reference check of the exact forward semantics.
    ref = jnp.maximum(x @ w1 + b1, 0.0) @ w2 + b2 + x
    assert out.shape == (batch, output_dim)
    assert jnp.allclose(out, ref, atol=1e-5, rtol=1e-5)

    print("KERNEL_OK")
</pallas_src>

<mosaic_0001>
module attributes {stable_mosaic.version = 11 : i64} {
  func.func @two_layer_nn_kernel(%arg0: i32, %arg1: memref<8x128xf32, #tpu.memory_space<vmem>>, %arg2: memref<128x128xf32, #tpu.memory_space<vmem>>, %arg3: memref<1x128xf32, #tpu.memory_space<vmem>>, %arg4: memref<128x128xf32, #tpu.memory_space<vmem>>, %arg5: memref<1x128xf32, #tpu.memory_space<vmem>>, %arg6: memref<8x128xf32, #tpu.memory_space<vmem>>) attributes {dimension_semantics = [#tpu.dimension_semantics<parallel>], iteration_bounds = array<i64: 1>, scalar_prefetch = 0 : i64, scratch_operands = 0 : i64, tpu.core_type = #tpu.core_type<tc>, window_params = [{transform_indices = @transform_0, window_bounds = array<i64: 8, 128>}, {pipeline_mode = #tpu.pipeline_mode<synchronous>, transform_indices = @transform_1, window_bounds = array<i64: 128, 128>}, {pipeline_mode = #tpu.pipeline_mode<synchronous>, transform_indices = @transform_2, window_bounds = array<i64: 1, 128>}, {pipeline_mode = #tpu.pipeline_mode<synchronous>, transform_indices = @transform_3, window_bounds = array<i64: 128, 128>}, {pipeline_mode = #tpu.pipeline_mode<synchronous>, transform_indices = @transform_4, window_bounds = array<i64: 1, 128>}, {transform_indices = @transform_5, window_bounds = array<i64: 8, 128>}]} {
    %c0 = arith.constant 0 : index
    %c0_0 = arith.constant 0 : index
    %0 = vector.load %arg1[%c0, %c0_0] : memref<8x128xf32, #tpu.memory_space<vmem>>, vector<8x128xf32>
    %c0_1 = arith.constant 0 : index
    %c0_2 = arith.constant 0 : index
    %1 = vector.load %arg2[%c0_1, %c0_2] : memref<128x128xf32, #tpu.memory_space<vmem>>, vector<128x128xf32>
    %cst = arith.constant dense<0.000000e+00> : vector<8x128xf32>
    %2 = tpu.matmul %0, %1, %cst {dimension_numbers = #tpu.dot_dimension_numbers<[1], [0], [0], [1], [0, 0, 1, 1], [], []>} : vector<8x128xf32>, vector<128x128xf32>, vector<8x128xf32> -> vector<8x128xf32>
    %c0_3 = arith.constant 0 : index
    %c0_4 = arith.constant 0 : index
    %3 = vector.load %arg3[%c0_3, %c0_4] : memref<1x128xf32, #tpu.memory_space<vmem>>, vector<1x128xf32>
    %4 = vector.broadcast %3 : vector<1x128xf32> to vector<8x128xf32>
    %5 = arith.addf %2, %4 : vector<8x128xf32>
    %cst_5 = arith.constant 0.000000e+00 : f32
    %6 = vector.broadcast %cst_5 : f32 to vector<8x128xf32>
    %7 = arith.maximumf %5, %6 : vector<8x128xf32>
    %c0_6 = arith.constant 0 : index
    %c0_7 = arith.constant 0 : index
    %8 = vector.load %arg4[%c0_6, %c0_7] : memref<128x128xf32, #tpu.memory_space<vmem>>, vector<128x128xf32>
    %cst_8 = arith.constant dense<0.000000e+00> : vector<8x128xf32>
    %9 = tpu.matmul %7, %8, %cst_8 {dimension_numbers = #tpu.dot_dimension_numbers<[1], [0], [0], [1], [0, 0, 1, 1], [], []>} : vector<8x128xf32>, vector<128x128xf32>, vector<8x128xf32> -> vector<8x128xf32>
    %c0_9 = arith.constant 0 : index
    %c0_10 = arith.constant 0 : index
    %10 = vector.load %arg5[%c0_9, %c0_10] : memref<1x128xf32, #tpu.memory_space<vmem>>, vector<1x128xf32>
    %11 = vector.broadcast %10 : vector<1x128xf32> to vector<8x128xf32>
    %12 = arith.addf %9, %11 : vector<8x128xf32>
    %13 = arith.addf %12, %0 : vector<8x128xf32>
    %c0_11 = arith.constant 0 : index
    %c0_12 = arith.constant 0 : index
    %14 = vector.load %arg6[%c0_11, %c0_12] : memref<8x128xf32, #tpu.memory_space<vmem>>, vector<8x128xf32>
    tpu.vector_store %arg6[%c0_11, %c0_12], %13 {strides = array<i32>} : memref<8x128xf32, #tpu.memory_space<vmem>>, vector<8x128xf32>,
    return
  }
  func.func @transform_0(%arg0: i32) -> (i32, i32) {
    %c0_i32 = arith.constant 0 : i32
    %c0_i32_0 = arith.constant 0 : i32
    return %arg0, %c0_i32 : i32, i32
  }
  func.func @transform_1(%arg0: i32) -> (i32, i32) {
    %c0_i32 = arith.constant 0 : i32
    %c0_i32_0 = arith.constant 0 : i32
    %c0_i32_1 = arith.constant 0 : i32
    return %c0_i32, %c0_i32_0 : i32, i32
  }
  func.func @transform_2(%arg0: i32) -> (i32, i32) {
    %c0_i32 = arith.constant 0 : i32
    %c0_i32_0 = arith.constant 0 : i32
    %c0_i32_1 = arith.constant 0 : i32
    return %c0_i32, %c0_i32_0 : i32, i32
  }
  func.func @transform_3(%arg0: i32) -> (i32, i32) {
    %c0_i32 = arith.constant 0 : i32
    %c0_i32_0 = arith.constant 0 : i32
    %c0_i32_1 = arith.constant 0 : i32
    return %c0_i32, %c0_i32_0 : i32, i32
  }
  func.func @transform_4(%arg0: i32) -> (i32, i32) {
    %c0_i32 = arith.constant 0 : i32
    %c0_i32_0 = arith.constant 0 : i32
    %c0_i32_1 = arith.constant 0 : i32
    return %c0_i32, %c0_i32_0 : i32, i32
  }
  func.func @transform_5(%arg0: i32) -> (i32, i32) {
    %c0_i32 = arith.constant 0 : i32
    %c0_i32_0 = arith.constant 0 : i32
    return %arg0, %c0_i32 : i32, i32
  }
}

</mosaic_0001>

<bundles_post_ra>
// kernel: tpu_custom_call.1
= control target key start
LH: loop header
LB: loop body
LE: loop exit
PB: predicated region body
PF: predicated region fallthrough
CT: control target
= control target key end

     0   :  { %10 = vsyncpa [#allocation3], 0  ;;  %s638_s0 = inlined_call_operand.hbm [shape: f32[8,128], index: 0, kind: input, shape index: {}]   ;;  %s639_s1 = inlined_call_operand.hbm [shape: f32[128,128], index: 1, kind: input, shape index: {}]   ;;  %s640_s2 = inlined_call_operand.vmem [shape: f32[1,128], index: 2, kind: input, shape index: {}]   ;;  %s641_s3 = inlined_call_operand.hbm [shape: f32[128,128], index: 3, kind: input, shape index: {}]   ;;  %s642_s4 = inlined_call_operand.vmem [shape: f32[1,128], index: 4, kind: input, shape index: {}]   ;;  %s643_s5 = inlined_call_operand.hbm [shape: f32[8,128], index: 5, kind: output, shape index: {}]  }
   0x1   :  { %11 = vsyncpa [#allocation6], 0 }
   0x2   :  { %12 = vsyncpa [#allocation4], 0  ;;  %s523_s18 = smov [#allocation5]   ;;  %s429_s22 = scalar_lea.hbm %s639_s1, 2048 }
   0x3   :  { %s28_s19 = sshll.u32 %s523_s18, 4  ;;  %p430_p0 = scmp.ne.s32.totalorder %s639_s1, %s429_s22  ;;  %s29_s19 = int_to_ptr.vmem [resolvable:$true] %s28_s19 }
   0x4   :  { %p433_p1 = scmp.lt.u32.totalorder %s429_s22, %s639_s1 }
   0x6   :  { %p435_p2 = pnand %p433_p1, %p430_p0 }
   0x8   :  { %438 = shalt.err (!%p435_p2)
}
   0x9   :  { %s439_s27 = scalar_lea.vmem %s29_s19, 2048  ;;  %p444_p4 = scmp.lt.s32.totalorder %s29_s19, %s29_s19 }
   0xa   :  { %p440_p3 = scmp.ne.s32.totalorder %s29_s19, %s439_s27  ;;  %p445_p5 = scmp.lt.s32.totalorder %s439_s27, %s439_s27 }
   0xc   :  { %p446_p6 = por %p445_p5, %p444_p4 }
   0xe   :  { %p447_p7 = pnand %p446_p6, %p440_p3 }
  0x10   :  { %450 = shalt.err (!%p447_p7)
}
  0x11   :  { %s524_s28 = smov 128   ;;  %s525_s29 = smov 8  }
  0x12   :  { %34 = dma.hbm_to_vmem [thread:$0]  %s639_s1, 2048, %s29_s19, [#allocation6], %s524_s28, %s524_s28, %s525_s29  }
  0x13   :  { %s526_s7 = smov [#allocation2]   ;;  %s527_s9 = smov [#allocation7]  }
  0x14   :  { %s19_s8 = sshll.u32 %s526_s7, 4  ;;  %s42_s10 = sshll.u32 %s527_s9, 4  ;;  %s20_s8 = int_to_ptr.vmem [resolvable:$true] %s19_s8  ;;  %s43_s10 = int_to_ptr.vmem [resolvable:$true] %s42_s10 }
  0x15   :  { %s451_s13 = scalar_lea.hbm %s638_s0, 128 }
  0x16   :  { %p452_p8 = scmp.ne.s32.totalorder %s638_s0, %s451_s13  ;;  %p455_p9 = scmp.lt.u32.totalorder %s451_s13, %s638_s0 }
  0x18   :  { %p457_p10 = pnand %p455_p9, %p452_p8 }
  0x1a   :  { %460 = shalt.err (!%p457_p10)
}
  0x1b   :  { %s461_s1 = scalar_lea.vmem %s20_s8, 128  ;;  %p466_p12 = scmp.lt.s32.totalorder %s20_s8, %s20_s8 }
  0x1c   :  { %p462_p11 = scmp.ne.s32.totalorder %s20_s8, %s461_s1  ;;  %p467_p13 = scmp.lt.s32.totalorder %s461_s1, %s461_s1 }
  0x1e   :  { %p468_p0 = por %p467_p13, %p466_p12 }
  0x20   :  { %p469_p1 = pnand %p468_p0, %p462_p11 }
  0x22   :  { %472 = shalt.err (!%p469_p1)
}
  0x23   :  { %22 = dma.hbm_to_vmem [thread:$0]  %s638_s0, 128, %s20_s8, [#allocation3]  }
  0x24   :  { %s473_s22 = scalar_lea.hbm %s641_s3, 2048 }
  0x25   :  { %p474_p2 = scmp.ne.s32.totalorder %s641_s3, %s473_s22  ;;  %p477_p3 = scmp.lt.u32.totalorder %s473_s22, %s641_s3 }
  0x27   :  { %p479_p4 = pnand %p477_p3, %p474_p2 }
  0x29   :  { %482 = shalt.err (!%p479_p4)
}
  0x2a   :  { %s483_s27 = scalar_lea.vmem %s43_s10, 2048  ;;  %p488_p6 = scmp.lt.s32.totalorder %s43_s10, %s43_s10 }
  0x2b   :  { %p484_p5 = scmp.ne.s32.totalorder %s43_s10, %s483_s27  ;;  %p489_p7 = scmp.lt.s32.totalorder %s483_s27, %s483_s27 }
  0x2d   :  { %p490_p8 = por %p489_p7, %p488_p6 }
  0x2f   :  { %p491_p9 = pnand %p490_p8, %p484_p5 }
  0x31   :  { %494 = shalt.err (!%p491_p9)
}
  0x32   :  { %48 = dma.hbm_to_vmem [thread:$0]  %s641_s3, 2048, %s43_s10, [#allocation6], %s524_s28, %s524_s28, %s525_s29  }
  0x33   :  { %517 = dma.done.wait [#allocation3], 128  }
  0x34   :  { %518 = vsyncadd [#allocation3], 4294967168 }
  0x35   :  { %519 = dma.done.wait [#allocation6], 4096  }
  0x36   :  { %520 = vsyncadd [#allocation6], 4294963200  ;;  %v528_v0 = vmov 0.0|0.0   ;;  %vm529_vm0 = vmmov 0   ;;  %v530_v1 = vmov 0.0   ;;  %v61_v2 = vld [vmem:[#allocation5] sm:$0xff] }
  0x37   :  { %372 = vmatprep.subr.bf16.mxu0 %v528_v0  ;;  %334 = vmatprep.mubr.msk.f32.mxu0 %vm529_vm0, %v530_v1  ;;  %v62_v3 = vld [vmem:[#allocation5 + $0x8] sm:$0xff]  ;;  %v63_v4 = vld [vmem:[#allocation5 + $0x10] sm:$0xff]  ;;  %v64_v6 = vld [vmem:[#allocation5 + $0x18] sm:$0xff]  ;;  %s531_s7 = smov [#allocation8]  }
  0x38   :  { %396 = vmatprep.subr.bf16.mxu1 %v528_v0  ;;  %369 = vmatprep.mubr.msk.f32.mxu1 %vm529_vm0, %v530_v1  ;;  %v373_v5 = vpack.c.bf16 %v62_v3, %v61_v2  ;;  %v376_v7 = vpack.c.bf16 %v64_v6, %v63_v4  ;;  %v65_v8 = vld [vmem:[#allocation5 + $0x20] sm:$0xff]  ;;  %v66_v9 = vld [vmem:[#allocation5 + $0x28] sm:$0xff]  ;;  %v157_v12 = vld [vmem:[#allocation7 + $0x10] sm:$0xff]  ;;  %s256_s8 = sshll.u32 %s531_s7, 4  ;;  %s257_s8 = int_to_ptr.vmem [resolvable:$true] %s256_s8 }
  0x39   :  { %v155_v10 = vld [vmem:[#allocation7] sm:$0xff]  ;;  %v156_v11 = vld [vmem:[#allocation7 + $0x8] sm:$0xff]  ;;  %v158_v13 = vld [vmem:[#allocation7 + $0x18] sm:$0xff]  ;;  %v379_v14 = vpack.c.bf16 %v66_v9, %v65_v8  ;;  %s495_s9 = scalar_lea.vmem %s257_s8, 128  ;;  %p500_p11 = scmp.lt.s32.totalorder %s257_s8, %s257_s8 }
  0x3a   :  { %374 = vmatpush3.bf16.msra.mxu0 %v373_v5  ;;  %v397_v15 = vpack.c.bf16 %v156_v11, %v155_v10  ;;  %v67_v16 = vld [vmem:[#allocation5 + $0x30] sm:$0xff]  ;;  %v68_v17 = vld [vmem:[#allocation5 + $0x38] sm:$0xff]  ;;  %v400_v18 = vpack.c.bf16 %v158_v13, %v157_v12  ;;  %v159_v19 = vld [vmem:[#allocation7 + $0x20] sm:$0xff]  ;;  %p496_p10 = scmp.ne.s32.totalorder %s257_s8, %s495_s9  ;;  %p501_p12 = scmp.lt.s32.totalorder %s495_s9, %s495_s9 }
  0x3b   :  { %375 = vmatprep.subr.bf16.mxu0 %v528_v0  ;;  %v160_v20 = vld [vmem:[#allocation7 + $0x28] sm:$0xff]  ;;  %v382_v21 = vpack.c.bf16 %v68_v17, %v67_v16  ;;  %v69_v22 = vld [vmem:[#allocation5 + $0x40] sm:$0xff]  ;;  %v161_v25 = vld [vmem:[#allocation7 + $0x30] sm:$0xff] }
  0x3c   :  { %398 = vmatpush3.bf16.msra.mxu1 %v397_v15  ;;  %v70_v23 = vld [vmem:[#allocation5 + $0x48] sm:$0xff]  ;;  %v403_v24 = vpack.c.bf16 %v160_v20, %v159_v19  ;;  %v162_v26 = vld [vmem:[#allocation7 + $0x38] sm:$0xff]  ;;  %v71_v28 = vld [vmem:[#allocation5 + $0x50] sm:$0xff]  ;;  %p502_p13 = por %p501_p12, %p500_p11 }
  0x3d   :  { %399 = vmatprep.subr.bf16.mxu1 %v528_v0  ;;  %v385_v27 = vpack.c.bf16 %v70_v23, %v69_v22  ;;  %v72_v29 = vld [vmem:[#allocation5 + $0x58] sm:$0xff]  ;;  %v406_v30 = vpack.c.bf16 %v162_v26, %v161_v25  ;;  %v163_v31 = vld [vmem:[#allocation7 + $0x40] sm:$0xff]  ;;  %v164_v32 = vld [vmem:[#allocation7 + $0x48] sm:$0xff] }
  0x3e   :  { %377 = vmatpush3.bf16.msra.mxu0 %v376_v7  ;;  %v388_v33 = vpack.c.bf16 %v72_v29, %v71_v28  ;;  %v73_v34 = vld [vmem:[#allocation5 + $0x60] sm:$0xff]  ;;  %v74_v35 = vld [vmem:[#allocation5 + $0x68] sm:$0xff]  ;;  %v409_v36 = vpack.c.bf16 %v164_v32, %v163_v31  ;;  %v165_v37 = vld [vmem:[#allocation7 + $0x50] sm:$0xff]  ;;  %p503_p0 = pnand %p502_p13, %p496_p10 }
  0x3f   :  { %378 = vmatprep.subr.bf16.mxu0 %v528_v0  ;;  %v166_v38 = vld [vmem:[#allocation7 + $0x58] sm:$0xff]  ;;  %v391_v39 = vpack.c.bf16 %v74_v35, %v73_v34  ;;  %v75_v40 = vld [vmem:[#allocation5 + $0x70] sm:$0xff]  ;;  %v167_v43 = vld [vmem:[#allocation7 + $0x60] sm:$0xff] }
  0x40   :  { %401 = vmatpush3.bf16.msra.mxu1 %v400_v18  ;;  %v76_v41 = vld [vmem:[#allocation5 + $0x78] sm:$0xff]  ;;  %v412_v42 = vpack.c.bf16 %v166_v38, %v165_v37  ;;  %v168_v44 = vld [vmem:[#allocation7 + $0x68] sm:$0xff]  ;;  %v169_v48 = vld [vmem:[#allocation7 + $0x70] sm:$0xff] }
  0x41   :  { %402 = vmatprep.subr.bf16.mxu1 %v528_v0  ;;  %v394_v45 = vpack.c.bf16 %v76_v41, %v75_v40  ;;  %v415_v46 = vpack.c.bf16 %v168_v44, %v167_v43  ;;  %v60_v47 = vld [vmem:[#allocation2] sm:$0xff] }
  0x42   :  { %380 = vmatpush3.bf16.msra.mxu0 %v379_v14  ;;  %v170_v49 = vld [vmem:[#allocation7 + $0x78] sm:$0xff] }
  0x43   :  { %381 = vmatprep.subr.bf16.mxu0 %v528_v0  ;;  %v418_v50 = vpack.c.bf16 %v170_v49, %v169_v48  ;;  %v266_v51 = vld [vmem:[%s640_s2] ss:$0 sm:$0xff] }
  0x44   :  { %404 = vmatpush3.bf16.msra.mxu1 %v403_v24  ;;  %v267_v56 = vld [vmem:[%s642_s4] ss:$0 sm:$0xff] }
  0x45   :  { %405 = vmatprep.subr.bf16.mxu1 %v528_v0 }
  0x46   :  { %383 = vmatpush3.bf16.msra.mxu0 %v382_v21 }
  0x47   :  { %384 = vmatprep.subr.bf16.mxu0 %v528_v0 }
  0x48   :  { %407 = vmatpush3.bf16.msra.mxu1 %v406_v30 }
  0x49   :  { %408 = vmatprep.subr.bf16.mxu1 %v528_v0 }
  0x4a   :  { %386 = vmatpush3.bf16.msra.mxu0 %v385_v27 }
  0x4b   :  { %387 = vmatprep.subr.bf16.mxu0 %v528_v0 }
  0x4c   :  { %410 = vmatpush3.bf16.msra.mxu1 %v409_v36 }
  0x4d   :  { %411 = vmatprep.subr.bf16.mxu1 %v528_v0 }
  0x4e   :  { %389 = vmatpush3.bf16.msra.mxu0 %v388_v33 }
  0x4f   :  { %390 = vmatprep.subr.bf16.mxu0 %v528_v0 }
  0x50   :  { %413 = vmatpush3.bf16.msra.mxu1 %v412_v42 }
  0x51   :  { %414 = vmatprep.subr.bf16.mxu1 %v528_v0 }
  0x52   :  { %392 = vmatpush3.bf16.msra.mxu0 %v391_v39 }
  0x53   :  { %393 = vmatprep.subr.bf16.mxu0 %v528_v0 }
  0x54   :  { %416 = vmatpush3.bf16.msra.mxu1 %v415_v46 }
  0x55   :  { %417 = vmatprep.subr.bf16.mxu1 %v528_v0 }
  0x56   :  { %395 = vmatpush3.bf16.msra.mxu0 %v394_v45 }
  0x58   :  { %419 = vmatpush3.bf16.msra.mxu1 %v418_v50 }
  0x59   :  { %335 = vmatmul.mubr.f32.vlgmr.msra.gmra.mrb[0].mxu0 %v60_v47 }
 0x12c   :  { %v150_v52 = vpop.f32.mrb[0].mxu0 }
 0x12d   :  { %v151_v53 = vadd.f32 %v266_v51, %v150_v52  ;;  %v336_v54 = vpop.f32.mrb[1].mxu0 }
 0x12f   :  { %v154_v55 = vmax.f32 %v151_v53, 0.0 }
 0x131   :  { %370 = vmatmul.mubr.f32.vlgmr.msra.gmra.mrb[0].mxu1 %v154_v55 }
 0x204   :  { %v244_v57 = vpop.f32.mrb[0].mxu1 }
 0x205   :  { %v245_v58 = vadd.f32 %v267_v56, %v244_v57  ;;  %v371_v59 = vpop.f32.mrb[1].mxu1 }
 0x207   :  { %v248_v60 = vadd.f32 %v245_v58, %v60_v47 }
 0x209   :  { %249 = vst [vmem:[#allocation8] sm:$0xff] %v248_v60 }
 0x20a   :  { %506 = shalt.err (!%p503_p0)
}
 0x20b   :  { %s507_s11 = scalar_lea.hbm %s643_s5, 128 }
 0x20c   :  { %p508_p1 = scmp.ne.s32.totalorder %s643_s5, %s507_s11  ;;  %p511_p2 = scmp.lt.u32.totalorder %s507_s11, %s643_s5 }
 0x20e   :  { %p513_p3 = pnand %p511_p2, %p508_p1 }
 0x210   :  { %516 = shalt.err (!%p513_p3)
}
 0x211   :  { %259 = dma.vmem_to_hbm [thread:$0]  %s257_s8, 128, %s643_s5, [#allocation4]  }
 0x212   :  { %521 = dma.done.wait [#allocation4], 128  }
 0x213   :  { %522 = vsyncadd [#allocation4], 4294967168 }
 0x214   :  { %263 = vsyncpa [#allocation3], 1 }
 0x215   :  { %264 = vsyncpa [#allocation6], 1 }
 0x216   :  { %265 = vsyncpa [#allocation4], 1 }

</bundles_post_ra>
